<compile_context>
chip_gen: v5e
topology: v5e:2x2
jax: 0.10.0
libtpu: 0.0.40
codegen_flags: <defaults>
</compile_context>

<pallas_src>
import functools
import math

import jax
import jax.numpy as jnp
from jax.experimental import pallas as pl
from jax.experimental.pallas import tpu as pltpu


def make_positional_encoding(embed_dim: int, max_len: int = 48) -> jnp.ndarray:
    """Deterministically build the sinusoidal PE buffer, matching torch init.

    Returns pe of shape (1, max_len, embed_dim), float32.
    """
    padded_dim = embed_dim if embed_dim % 2 == 0 else embed_dim + 1
    pe = jnp.zeros((max_len, padded_dim), dtype=jnp.float32)
    position = jnp.arange(0, max_len, dtype=jnp.float32)[:, None]          # (max_len, 1)
    div_term = jnp.exp(
        jnp.arange(0, embed_dim, 2, dtype=jnp.float32)
        * (-math.log(10000.0) / embed_dim)
    )                                                                       # (ceil(D/2),)
    pe = pe.at[:, 0::2].set(jnp.sin(position * div_term))
    pe = pe.at[:, 1::2].set(jnp.cos(position * div_term))
    pe = pe[:, :embed_dim]                                                  # (max_len, D)
    return pe[None, :, :]                                                   # (1, max_len, D)


def _largest_aligned_divisor(total: int, align: int, max_val: int):
    """Largest divisor of `total` that is a multiple of `align` and <= max_val."""
    if total % align != 0 or max_val < align:
        return None
    n = total // align
    best = None
    for c in range(1, n + 1):
        if n % c == 0 and c * align <= max_val:
            best = c * align
    return best


# ----------------------------------------------------------------------------
# Kernels.  pe is a single VMEM-resident block (constant index_map); the
# per-tile slice is taken in-kernel with pl.ds so it is DMA'd from HBM once.
# The add is computed in f32 and cast to the output dtype (VPU cast is free:
# the kernel is HBM-bandwidth bound).
# ----------------------------------------------------------------------------

def _add_pe_rows_kernel(x_ref, pe_ref, o_ref, *, tr, td, pe_rows):
    # x_ref/o_ref: (tr, td) tile of the (B*S, D) row view.
    # pe_ref:      (S, D) float32, fully resident in VMEM.
    i = pl.program_id(0)                      # row-block index
    j = pl.program_id(1)                      # lane-block index
    n_per = pe_rows // tr                     # row blocks per pe period (static)
    r0 = pl.multiple_of((i % n_per) * tr, 8)
    c0 = pl.multiple_of(j * td, 128)
    pe_blk = pe_ref[pl.ds(r0, tr), pl.ds(c0, td)]            # (tr, td) f32
    o_ref[...] = (x_ref[...].astype(jnp.float32) + pe_blk).astype(o_ref.dtype)


def _add_pe_flat_kernel(x_ref, pe_ref, o_ref, *, tl):
    # x_ref/o_ref: (tb, tl) tile of the flattened (B, S*D) view (lane-padded).
    # pe_ref:      (1, L_pad) float32, fully resident in VMEM.
    li = pl.program_id(1)
    c0 = pl.multiple_of(li * tl, 128)
    pe_blk = pe_ref[:, pl.ds(c0, tl)]                         # (1, tl) f32
    o_ref[...] = (x_ref[...].astype(jnp.float32) + pe_blk).astype(o_ref.dtype)


# ----------------------------------------------------------------------------
# Wrappers.
# ----------------------------------------------------------------------------

def _forward_rows(x, pe_sd, max_block_elems):
    """Sublane/lane-dense path: D % 128 == 0 and S % 8 == 0."""
    B, S, D = x.shape
    R = B * S
    x_rows = x.reshape(R, D)

    # Lane tile: largest 128-multiple divisor of D (leave >= 8 sublanes of budget).
    td = _largest_aligned_divisor(D, 128, max(128, max_block_elems // 8)) or D
    # Row tile: multiple-of-8 divisor of S (keeps the pe slice one contiguous period).
    tr = _largest_aligned_divisor(S, 8, max(8, max_block_elems // td)) or S

    # v7x has 2 TensorCores: make sure a "parallel" axis has >= 2 steps.
    if R // tr == 1 and D // td == 1:
        td_split = _largest_aligned_divisor(D, 128, D // 2)
        if td_split is not None:
            td = td_split
        else:
            tr_split = _largest_aligned_divisor(S, 8, tr // 2)
            if tr_split is not None:
                tr = tr_split

    grid = (R // tr, D // td)
    kernel = functools.partial(_add_pe_rows_kernel, tr=tr, td=td, pe_rows=S)

    out = pl.pallas_call(
        kernel,
        out_shape=jax.ShapeDtypeStruct((R, D), x.dtype),
        grid_spec=pltpu.PrefetchScalarGridSpec(
            num_scalar_prefetch=0,
            grid=grid,
            in_specs=[
                pl.BlockSpec((tr, td), lambda i, j: (i, j)),    # x tile
                pl.BlockSpec((S, D), lambda i, j: (0, 0)),      # pe: resident once
            ],
            out_specs=pl.BlockSpec((tr, td), lambda i, j: (i, j)),
        ),
        input_output_aliases={0: 0},                            # donate x rows buffer
        compiler_params=pltpu.CompilerParams(
            dimension_semantics=("parallel", "parallel"),
        ),
    )(x_rows, pe_sd)
    return out.reshape(B, S, D)


def _forward_flat(x, pe_sd, max_block_elems):
    """Lane-dense fallback: flatten to (B, S*D), pad lane axis to 128."""
    B, S, D = x.shape
    L = S * D
    L_pad = ((L + 127) // 128) * 128
    x_flat = x.reshape(B, L)
    pe_flat = pe_sd.reshape(1, L)
    if L_pad != L:
        # Pad so every tile gets unmasked lane-dense stores (layout plumbing only).
        x_flat = jnp.pad(x_flat, ((0, 0), (0, L_pad - L)))
        pe_flat = jnp.pad(pe_flat, ((0, 0), (0, L_pad - L)))

    # Batch (sublane) tile: whole batch when small / unaligned, else 8-aligned chunks.
    tb = B
    if B > 8 and B % 8 == 0:
        tb = _largest_aligned_divisor(B, 8, max(8, max_block_elems // 128)) or B
    # Lane tile: largest 128-multiple divisor of L_pad under budget.
    tl = _largest_aligned_divisor(L_pad, 128, max(128, max_block_elems // tb)) or L_pad

    # v7x: guarantee >= 2 grid steps on a "parallel" axis when possible.
    if B // tb == 1 and L_pad // tl == 1:
        tl_split = _largest_aligned_divisor(L_pad, 128, L_pad // 2)
        if tl_split is not None:
            tl = tl_split

    grid = (B // tb, L_pad // tl)
    kernel = functools.partial(_add_pe_flat_kernel, tl=tl)

    out = pl.pallas_call(
        kernel,
        out_shape=jax.ShapeDtypeStruct((B, L_pad), x.dtype),
        grid_spec=pltpu.PrefetchScalarGridSpec(
            num_scalar_prefetch=0,
            grid=grid,
            in_specs=[
                pl.BlockSpec((tb, tl), lambda bi, li: (bi, li)),   # x tile
                pl.BlockSpec((1, L_pad), lambda bi, li: (0, 0)),   # pe: resident once
            ],
            out_specs=pl.BlockSpec((tb, tl), lambda bi, li: (bi, li)),
        ),
        input_output_aliases={0: 0},                               # donate x flat buffer
        compiler_params=pltpu.CompilerParams(
            dimension_semantics=("parallel", "parallel"),
        ),
    )(x_flat, pe_flat)

    if L_pad != L:
        out = out[:, :L]
    return out.reshape(B, S, D)


def positional_encoding_forward(
    x: jnp.ndarray,
    pe: jnp.ndarray,
    *,
    vmem_target_bytes: int = 2 * 1024 * 1024,
    min_pallas_bytes: int = 256 * 1024,
) -> jnp.ndarray:
    """x: (B, S, D); pe: (1, max_len, D).  Returns (x + pe[:, :S, :]).astype(x.dtype)."""
    B, S, D = x.shape
    itemsize = jnp.dtype(x.dtype).itemsize
    total_bytes = B * S * D * itemsize

    # pe stays f32: the add is computed in f32 (matches the torch reference),
    # the result is cast back to the activation dtype.
    pe_sd = pe[0, :S, :].astype(jnp.float32)                    # (S, D) f32

    # Tiny-input bypass: a standalone pallas_call is pure fixed overhead here.
    if total_bytes < min_pallas_bytes:
        return (x.astype(jnp.float32) + pe_sd[None]).astype(x.dtype)

    # VMEM guardrail: double-buffered x-in + out is ~4x the block, plus the
    # resident pe.  Clamp to 3 MiB so we stay under v5e's 16 MiB scoped-VMEM
    # default and far under v7x's 64 MiB physical VMEM without needing
    # vmem_limit_bytes overrides.
    vmem_target_bytes = min(vmem_target_bytes, 3 * 1024 * 1024)
    max_block_elems = max(8 * 128, vmem_target_bytes // itemsize)

    if D % 128 == 0 and S % 8 == 0:
        return _forward_rows(x, pe_sd, max_block_elems)
    return _forward_flat(x, pe_sd, max_block_elems)


if __name__ == "__main__":
    key = jax.random.PRNGKey(0)
    k1, k2, k3, k4 = jax.random.split(key, 4)

    def ref(x, pe):
        s = x.shape[1]
        return (x.astype(jnp.float32) + pe[:, :s, :]).astype(x.dtype)

    # Test 1: module-scale shape (B=2, S=8, D=32) -> tiny-input bypass path.
    B, S, D = 2, 8, 32
    pe1 = make_positional_encoding(D, max_len=48)
    x1 = jax.random.normal(k1, (B, S, D), dtype=jnp.float32)
    out1 = jax.block_until_ready(positional_encoding_forward(x1, pe1))
    assert out1.shape == (B, S, D)
    assert jnp.allclose(out1, ref(x1, pe1), atol=1e-6, rtol=1e-6), "mismatch (bypass)"

    # Test 2: same shape forced through the Pallas flat path
    # (D % 128 != 0 -> (B, S*D) flatten, L=256 split into 2x128-lane tiles).
    out2 = jax.block_until_ready(
        positional_encoding_forward(x1, pe1, min_pallas_bytes=0)
    )
    assert jnp.allclose(out2, ref(x1, pe1), atol=1e-6, rtol=1e-6), "mismatch (flat)"

    # Test 3: rows path (D % 128 == 0, S % 8 == 0): sublane/lane-dense (B*S, D) view.
    B3, S3, D3 = 2, 16, 128
    pe3 = make_positional_encoding(D3, max_len=S3)
    x3 = jax.random.normal(k2, (B3, S3, D3), dtype=jnp.float32)
    out3 = jax.block_until_ready(
        positional_encoding_forward(x3, pe3, min_pallas_bytes=0)
    )
    assert jnp.allclose(out3, ref(x3, pe3), atol=1e-6, rtol=1e-6), "mismatch (rows)"

    # Test 4: flat path with a non-128-multiple lane extent (L = 8*40 = 320 -> padded to 384).
    B4, S4, D4 = 2, 8, 40
    pe4 = make_positional_encoding(D4, max_len=48)
    x4 = jax.random.normal(k3, (B4, S4, D4), dtype=jnp.float32)
    out4 = jax.block_until_ready(
        positional_encoding_forward(x4, pe4, min_pallas_bytes=0)
    )
    assert jnp.allclose(out4, ref(x4, pe4), atol=1e-6, rtol=1e-6), "mismatch (padded flat)"

    # Test 5: bf16 activations through the rows path; add in f32, cast result to bf16.
    x5 = jax.random.normal(k4, (B3, S3, D3), dtype=jnp.bfloat16)
    out5 = jax.block_until_ready(
        positional_encoding_forward(x5, pe3, min_pallas_bytes=0)
    )
    assert out5.dtype == jnp.bfloat16
    assert jnp.allclose(
        out5.astype(jnp.float32), ref(x5, pe3).astype(jnp.float32), atol=1e-2, rtol=1e-2
    ), "mismatch (bf16 rows)"

    print("KERNEL_OK")
</pallas_src>

<mosaic_0001>
module attributes {stable_mosaic.version = 11 : i64} {
  func.func @_add_pe_flat_kernel(%arg0: i32, %arg1: i32, %arg2: memref<2x128xf32, #tpu.memory_space<vmem>>, %arg3: memref<1x256xf32, #tpu.memory_space<vmem>>, %arg4: memref<2x128xf32, #tpu.memory_space<vmem>>) attributes {dimension_semantics = [#tpu.dimension_semantics<parallel>, #tpu.dimension_semantics<parallel>], iteration_bounds = array<i64: 1, 2>, scalar_prefetch = 0 : i64, scratch_operands = 0 : i64, tpu.core_type = #tpu.core_type<tc>, window_params = [{transform_indices = @transform_0, window_bounds = array<i64: 2, 128>}, {pipeline_mode = #tpu.pipeline_mode<synchronous>, transform_indices = @transform_1, window_bounds = array<i64: 1, 256>}, {transform_indices = @transform_2, window_bounds = array<i64: 2, 128>}]} {
    %c128_i32 = arith.constant 128 : i32
    %0 = arith.muli %arg1, %c128_i32 : i32
    %1 = tpu.assume_multiple %0, 128 : i32
    %c0 = arith.constant 0 : index
    %2 = arith.index_cast %1 : i32 to index
    %3 = vector.load %arg3[%c0, %2] : memref<1x256xf32, #tpu.memory_space<vmem>>, vector<1x128xf32>
    %c0_0 = arith.constant 0 : index
    %c0_1 = arith.constant 0 : index
    %4 = vector.load %arg2[%c0_0, %c0_1] : memref<2x128xf32, #tpu.memory_space<vmem>>, vector<2x128xf32>
    %5 = vector.broadcast %3 : vector<1x128xf32> to vector<2x128xf32>
    %6 = arith.addf %4, %5 : vector<2x128xf32>
    %c0_2 = arith.constant 0 : index
    %c0_3 = arith.constant 0 : index
    %7 = vector.load %arg4[%c0_2, %c0_3] : memref<2x128xf32, #tpu.memory_space<vmem>>, vector<2x128xf32>
    tpu.vector_store %arg4[%c0_2, %c0_3], %6 {strides = array<i32>} : memref<2x128xf32, #tpu.memory_space<vmem>>, vector<2x128xf32>,
    return
  }
  func.func @transform_0(%arg0: i32, %arg1: i32) -> (i32, i32) {
    %c0_i32 = arith.constant 0 : i32
    return %arg0, %arg1 : i32, i32
  }
  func.func @transform_1(%arg0: i32, %arg1: i32) -> (i32, i32) {
    %c0_i32 = arith.constant 0 : i32
    %c0_i32_0 = arith.constant 0 : i32
    %c0_i32_1 = arith.constant 0 : i32
    return %c0_i32, %c0_i32_0 : i32, i32
  }
  func.func @transform_2(%arg0: i32, %arg1: i32) -> (i32, i32) {
    %c0_i32 = arith.constant 0 : i32
    return %arg0, %arg1 : i32, i32
  }
}

</mosaic_0001>

<bundles_post_ra>
// kernel: tpu_custom_call.1
= control target key start
LH: loop header
LB: loop body
LE: loop exit
PB: predicated region body
PF: predicated region fallthrough
CT: control target
= control target key end

     0   :  { %7 = vsyncpa [#allocation3], 0  ;;  %s621_s0 = inlined_call_operand.hbm [shape: f32[2,256], index: 0, kind: input, shape index: {}, may-alias: {0,2}]   ;;  %s622_s1 = inlined_call_operand.vmem [shape: f32[1,256], index: 1, kind: input, shape index: {}]   ;;  %s623_s2 = inlined_call_operand.hbm [shape: f32[2,256], index: 2, kind: output, shape index: {}, may-alias: {0,2}]  }
   0x1   :  { %9 = vsyncpa [#allocation3 + $0x1], 0 }
   0x2   :  { %10 = vsyncpa [#allocation4], 0 }
   0x3   :  { %12 = vsyncpa [#allocation4 + $0x1], 0  ;;  %s497_s9 = smov 0   ;;  %s499_s10 = smov 0  }
   0x4   :  { %s501_s11 = smov 0   ;;  %s503_s12 = smov 0  }
   0x5   :  { %s505_s13 = smov 0   ;;  %s507_s14 = smov 0  }
   0x6 LB: > { %s291_s15 = sadd.s32 4294967295, %s480_s14   ;;  %s292_s16 = sadd.s32 4294967294, %s480_s14   ;;  %s480_s14 = sphi %s507_s14, %s18_s14   ;;  %s476_s13 = sphi %s505_s13, %s632_s13   ;;  %s472_s12 = sphi %s503_s12, %s631_s12   ;;  %s468_s11 = sphi %s501_s11, %s630_s11   ;;  %s464_s10 = sphi %s499_s10, %s629_s10   ;;  %s460_s9 = sphi %s497_s9, %s628_s9  }
   0x7   : > { %s27_s17 = sadd.s32 1, %s476_s13  ;;  %s39_s18 = sadd.s32 1, %s468_s11 }
   0x8   : > { %p28_p0 = scmp.ge.s32.totalorder %s27_s17, 2  ;;  %p46_p1 = scmp.ne.s32.totalorder %s468_s11, %s464_s10 }
   0x9   : > { %p47_p2 = scmp.eq.s32.totalorder %s480_s14, 0  ;;  %p52_p3 = scmp.ne.s32.totalorder %s464_s10, %s460_s9 }
   0xa   : > { %s634_s17 = smov (%p28_p0, %s27_s17), 0  ;;  %p53_p5 = scmp.eq.s32.totalorder %s291_s15, 0 }
   0xb   : > { %p538_p4 = por %p47_p2, %p46_p1  ;;  %s35_s20 = ssub.s32 %s476_s13, %s634_s17 }
   0xc   : > { %p99_p6 = scmp.eq.s32.totalorder %s291_s15, 1  ;;  %p37_p7 = scmp.eq.s32.totalorder %s35_s20, 0 }
   0xd   : > { %p544_p8 = por %p53_p5, %p52_p3  ;;  %p105_p10 = scmp.eq.s32.totalorder %s292_s16, 1 }
   0xe   : > { %p548_p9 = por %p99_p6, %p46_p1  ;;  %p294_p12 = scmp.ge.s32.totalorder %s480_s14, 2 }
   0xf   : > { %s553_s23 = scalar_select %p37_p7, %s468_s11, %s39_s18  }
  0x10   : > { %p555_p11 = por %p105_p10, %p52_p3  ;;  %p317_p13 = scmp.lt.s32.totalorder %s480_s14, 2 }
  0x11   : > { %s128_s25 = sand.u32 1, %s468_s11   ;;  %s296_s27 = sshll.u32 %s476_s13, 1 }
  0x12   : > { %s295_s26 = sshll.u32 %s128_s25, 1  ;;  %s138_s30 = scalar_lea.hbm %s621_s0, %s296_s27 }
  0x13   : > { %s132_s3 = scalar_lea.vmem [#allocation2], %s295_s26  ;;  %s140_s5 = sshll.u32 %s138_s30, 4  ;;  %s141_s5 = int_to_ptr.hbm [resolvable:$true] %s140_s5 }
  0x14   : > { %s142_s4 = sshll.u32 %s132_s3, 4  ;;  %p310_p0 = pnand %p317_p13, %p538_p4  ;;  %s143_s4 = int_to_ptr.vmem [resolvable:$true] %s142_s4 }
  0x15   : > { %p297_p1 = scmp.ge.s32.totalorder %s480_s14, 1  ;;  %p147_p2 = scmp.lt.s32.totalorder %s480_s14, 3 }
  0x16   : > { %s129_s6 = scalar_lea.sflag [#allocation3], %s128_s25 }
  0x17   : > { %312 = dma.hbm_to_vmem [thread:$0]  (!%p310_p0), %s141_s5, 32, %s143_s4, %s129_s6  }
  0x18   : > { %p148_p3 = pnand %p297_p1, %p147_p2 }
  0x19   : > { %s571_s7 = sand.u32 (!%p148_p3), 1, %s464_s10  }
  0x1a   : > { %151 = sbr.rel (%p148_p3) target bundleno = 48 (0x30), region = 28  ;;  %s298_s8 = sshll.u32 (!%p148_p3), %s571_s7, 1 }
  0x1b   : > { %s154_s15 = scalar_lea.sflag (!%p148_p3), [#allocation3], %s571_s7  ;;  %s157_s16 = scalar_lea.vmem (!%p148_p3), [#allocation2], %s298_s8 }
  0x1f   : > { %451 = dma.done.wait (%p544_p8), %s154_s15, 32  }
  0x20   : > { %453 = vsyncadd (%p544_p8), %s154_s15, 4294967264  ;;  %s300_s18 = sshll.u32 %s472_s12, 7  ;;  %s302_s20 = sshll.u32 %s472_s12, 1  ;;  %v184_v0 = vld [vmem:[%s157_s16] sm:$0x3] }
  0x21   : > { %s180_s19 = sshra.s32 %s300_s18, 7  ;;  %s203_s30 = scalar_lea.hbm %s623_s2, %s302_s20 }
  0x22   : > { %s182_s27 = scalar_lea.vmem %s622_s1, %s180_s19  ;;  %s178_s3 = scalar_lea.vmem [#allocation5], %s298_s8 }
  0x23   : > { %s205_s4 = sshll.u32 %s178_s3, 4  ;;  %s207_s5 = sshll.u32 %s203_s30, 4  ;;  %v367_v1 = vld [vmem:[%s182_s27] ss:$0 sm:$0xff]  ;;  %s206_s4 = int_to_ptr.vmem [resolvable:$true] %s205_s4  ;;  %s208_s5 = int_to_ptr.hbm [resolvable:$true] %s207_s5 }
  0x24   : > { %v188_v2 = vadd.f32 %v367_v1, %v184_v0  ;;  %s191_s21 = scalar_lea.sflag [#allocation4], %s571_s7  ;;  %s412_s12 = sshra.s32 %s208_s5, 4  ;;  %s413_s12 = int_to_ptr.hbm [resolvable:$true] %s412_s12 }
  0x25   : > { %s414_s6 = scalar_lea.hbm %s413_s12, 2  ;;  %s418_s8 = scalar_lea.hbm %s623_s2, 4 }
  0x26   : > { %189 = vst [vmem:[%s178_s3] sm:$0x3] %v188_v2  ;;  %p415_p4 = scmp.ne.s32.totalorder %s413_s12, %s414_s6  ;;  %p419_p7 = scmp.lt.s32.totalorder %s413_s12, %s623_s2 }
  0x27   : > { %p420_p8 = scmp.lt.s32.totalorder %s418_s8, %s414_s6 }
  0x28   : > { %p416_p5 = pnand %p415_p4, %p548_p9 }
  0x29   : > { %p421_p10 = por %p420_p8, %p419_p7 }
  0x2a   : > { %p417_p6 = pneg %p416_p5 }
  0x2c   : > { %p422_p13 = pnand %p421_p10, %p417_p6 }
  0x2e   : > { %425 = shalt.err (!%p422_p13)
}
  0x2f   : > { %307 = dma.vmem_to_hbm [thread:$0]  (%p548_p9), %s206_s4, 32, %s208_s5, %s191_s21  }
  0x30 PF: > { %s219_s7 = sand.u32 1, %s460_s9   ;;  %p314_p0 = pnand %p294_p12, %p555_p11 }
  0x31   : > { %s220_s16 = scalar_lea.sflag [#allocation4], %s219_s7 }
  0x32   : > { %p315_p1 = pneg %p314_p0 }
  0x34   : > { %455 = dma.done.wait (%p315_p1), %s220_s16, 32  }
  0x35   : > { %457 = vsyncadd (%p315_p1), %s220_s16, 4294967264  ;;  %s18_s14 = sadd.s32 1, %s480_s14   ;;  %s628_s9 = smov %s464_s10 }
  0x36   : > { %p15_p2 = scmp.ge.s32.totalorder %s18_s14, 4   ;;  %s629_s10 = smov %s468_s11 }
  0x37   : > { %s630_s11 = smov %s553_s23  ;;  %s631_s12 = smov %s476_s13 }
  0x38   : > { %s632_s13 = smov %s634_s17  ;;  %17 = sbr.rel (!%p15_p2) target bundleno = 6 (0x6), region = 74 }
  0x3d   :  { %226 = vsyncpa [#allocation3], 1 }
  0x3e   :  { %228 = vsyncpa [#allocation3 + $0x1], 1 }
  0x3f   :  { %229 = vsyncpa [#allocation4], 1 }
  0x40   :  { %231 = vsyncpa [#allocation4 + $0x1], 1 }

</bundles_post_ra>
